<compile_context>
chip_gen: v5e
topology: v5e:2x2
jax: 0.10.0
libtpu: 0.0.40
codegen_flags: <defaults>
</compile_context>

<pallas_src>
import functools

import jax
import jax.numpy as jnp
from jax.experimental import pallas as pl
from jax.experimental.pallas import tpu as pltpu

_LANE = 128
_SUBLANE = 8


def _round_up(x, m):
    return ((x + m - 1) // m) * m


def _cdiv(a, b):
    return (a + b - 1) // b


def _pick_tm(m, tm_max):
    """Rows per M tile: multiple of 8, >=2 tiles when possible (megacore), low padding."""
    if m <= _SUBLANE:
        return _SUBLANE
    n_tiles = max(2, _cdiv(m, tm_max))
    return min(_round_up(_cdiv(m, n_tiles), _SUBLANE), tm_max)


def _pick_tn(vp, tn_max):
    """Vocab columns per tile: multiple of 128 that divides the (lane-padded) vocab."""
    tn = min(tn_max, vp)
    if vp % tn != 0:
        tn = _LANE  # always divides, since vp is padded to a multiple of 128
    return tn


def _lm_head_kernel(ids_ref, embw1_ref, b1_ref, w2_ref, b2_ref, out_ref, h_ref):
    """Fused gather+MLP hidden (once per M tile) + vocab-head tile.

    ids_ref  : [TM, 1]  int32 token ids (padded rows carry id 0; wrapper slices them off)
    embw1_ref: [Vp, Hp] bf16 fused (embedding @ W1) table (grid-invariant, VMEM-resident)
    b1_ref   : [1, Hp]  f32
    w2_ref   : [Hp, TN] bf16 vocab-head tile      b2_ref: [1, TN] f32
    out_ref  : [TM, TN] f32
    h_ref    : [TM, Hp] bf16 VMEM scratch (tanh hidden state, cached across V tiles)
    """
    # Hidden state depends only on the M tile -> compute once at the first V step.
    @pl.when(pl.program_id(1) == 0)
    def _():
        tm = ids_ref.shape[0]
        vp = embw1_ref.shape[0]
        # Fused embedding gather as a one-hot MXU matmul (exact: 0/1 weights in bf16).
        ids = ids_ref[...]                                           # [TM, 1] int32
        iota = jax.lax.broadcasted_iota(jnp.int32, (tm, vp), 1)      # [TM, Vp]
        onehot = (iota == ids).astype(embw1_ref.dtype)               # bf16 0/1
        h = jnp.dot(onehot, embw1_ref[...],
                    preferred_element_type=jnp.float32) + b1_ref[...]  # f32 epilogue
        h_ref[...] = jnp.tanh(h).astype(h_ref.dtype)                 # bf16 cache

    # scores tile = hidden @ W2_tile + b2_tile  (bf16 MXU inputs, f32 accumulate).
    s = jnp.dot(h_ref[...], w2_ref[...],
                preferred_element_type=jnp.float32) + b2_ref[...]
    out_ref[...] = s.astype(out_ref.dtype)


@functools.partial(jax.jit, static_argnames=("tm_max", "tn_max"))
def lm_head_pallas(ids_flat, emb_w1, b1, w2, b2, *, tm_max=256, tn_max=512):
    """ids_flat: [M] int32; returns [M, Vp] f32 vocab scores (padded vocab included)."""
    m = ids_flat.shape[0]
    vp, hp = emb_w1.shape

    tm = _pick_tm(m, tm_max)
    m_pad = _round_up(m, tm)
    tn = _pick_tn(vp, tn_max)

    ids2d = ids_flat.astype(jnp.int32)
    if m_pad != m:
        ids2d = jnp.pad(ids2d, (0, m_pad - m))
    ids2d = ids2d.reshape(m_pad, 1)

    out = pl.pallas_call(
        _lm_head_kernel,
        out_shape=jax.ShapeDtypeStruct((m_pad, vp), jnp.float32),
        grid_spec=pltpu.PrefetchScalarGridSpec(
            num_scalar_prefetch=0,
            grid=(m_pad // tm, vp // tn),
            in_specs=[
                pl.BlockSpec((tm, 1), lambda i, j: (i, 0)),    # token ids for this M tile
                pl.BlockSpec((vp, hp), lambda i, j: (0, 0)),   # fused emb@W1 (resident)
                pl.BlockSpec((1, hp), lambda i, j: (0, 0)),    # b1
                pl.BlockSpec((hp, tn), lambda i, j: (0, j)),   # W2 vocab tile
                pl.BlockSpec((1, tn), lambda i, j: (0, j)),    # b2 vocab tile
            ],
            out_specs=pl.BlockSpec((tm, tn), lambda i, j: (i, j)),
            scratch_shapes=[pltpu.VMEM((tm, hp), jnp.bfloat16)],  # cached tanh hidden
        ),
        compiler_params=pltpu.CompilerParams(
            # M tiles independent -> sharded across v7x's 2 TensorCores (no-op v5e/v6e);
            # V axis "arbitrary" (sequential) so the hidden-state scratch is valid.
            dimension_semantics=("parallel", "arbitrary"),
            vmem_limit_bytes=64 * 1024 * 1024,  # v5e default scoped VMEM is only 16 MiB
        ),
    )(ids2d, emb_w1, b1, w2, b2)

    if m_pad != m:
        out = out[:m]
    return out


class GeneratorModuleJax:
    """Synthetic stand-in for GeneratorModule: forward(x) -> [B, S, V] vocab scores."""

    def __init__(self, vocab_size=128, embed_dim=32, hidden_dim=32, key=None):
        if key is None:
            key = jax.random.PRNGKey(0)
        k_emb, k_w1, k_w2 = jax.random.split(key, 3)
        self.vocab_size = vocab_size
        # Pad V/H to lane width so contraction/output dims fill the MXU and every block
        # is lane-dense (no masked partial-lane vld/vst). Zero padding is numerically free.
        self.v_pad = _round_up(vocab_size, _LANE)
        self.h_pad = _round_up(hidden_dim, _LANE)

        emb = jax.random.normal(k_emb, (vocab_size, embed_dim), jnp.float32) * 0.02
        w1 = jax.random.normal(k_w1, (embed_dim, hidden_dim), jnp.float32) * 0.1
        w2 = jax.random.normal(k_w2, (hidden_dim, vocab_size), jnp.float32) * 0.1

        # Weight-side precompute: fold the embedding table through W1 at init (f32 math,
        # stored bf16).  Biases and the tanh epilogue stay f32 (exact, cheap on v5e too).
        emb_w1 = emb @ w1                                                 # [V, H] f32
        self.emb_w1 = (jnp.zeros((self.v_pad, self.h_pad), jnp.bfloat16)
                       .at[:vocab_size, :hidden_dim]
                       .set(emb_w1.astype(jnp.bfloat16)))
        self.b1 = jnp.zeros((1, self.h_pad), jnp.float32)
        self.w2 = (jnp.zeros((self.h_pad, self.v_pad), jnp.bfloat16)
                   .at[:hidden_dim, :vocab_size].set(w2.astype(jnp.bfloat16)))
        self.b2 = jnp.zeros((1, self.v_pad), jnp.float32)

    def forward(self, x):
        # x: [B, S] int32 token ids -> [B, S, V] f32 scores (same contract as
        # GeneratorModule.forward -> pretrain_model(x)).
        b, s = x.shape
        scores = lm_head_pallas(x.reshape(-1), self.emb_w1, self.b1, self.w2, self.b2)
        if self.v_pad != self.vocab_size:
            scores = scores[:, :self.vocab_size]
        return scores.reshape(b, s, self.vocab_size)


if __name__ == "__main__":
    key = jax.random.PRNGKey(0)
    k_tok, k_params = jax.random.split(key)

    B, S, V, E, H = 2, 8, 128, 32, 32
    x = jax.random.randint(k_tok, (B, S), 0, V, dtype=jnp.int32)

    model = GeneratorModuleJax(vocab_size=V, embed_dim=E, hidden_dim=H, key=k_params)
    scores = jax.block_until_ready(model.forward(x))
    assert scores.shape == (B, S, V)
    assert scores.dtype == jnp.float32

    # Plain-JAX reference on the same (bf16-stored) fused weights, mirroring the
    # kernel's f32 epilogue and bf16 hidden-state cache.
    rows = model.emb_w1[x.reshape(-1)].astype(jnp.float32)               # exact gather
    h_ref = jnp.tanh(rows + model.b1).astype(jnp.bfloat16)               # bf16 h cache
    ref = jnp.dot(h_ref, model.w2, preferred_element_type=jnp.float32) + model.b2
    ref = ref[:, :V].reshape(B, S, V)
    assert jnp.allclose(scores, ref, atol=5e-3, rtol=5e-3), "mismatch vs reference"
    print("KERNEL_OK")
</pallas_src>

<mosaic_0001>
module attributes {stable_mosaic.version = 11 : i64} {
  func.func @_lm_head_kernel(%arg0: i32, %arg1: i32, %arg2: memref<8x1xi32, #tpu.memory_space<vmem>>, %arg3: memref<128x128xbf16, #tpu.memory_space<vmem>>, %arg4: memref<1x128xf32, #tpu.memory_space<vmem>>, %arg5: memref<128x128xbf16, #tpu.memory_space<vmem>>, %arg6: memref<1x128xf32, #tpu.memory_space<vmem>>, %arg7: memref<8x128xf32, #tpu.memory_space<vmem>>, %arg8: memref<8x128xbf16, #tpu.memory_space<vmem>>) attributes {dimension_semantics = [#tpu.dimension_semantics<parallel>, #tpu.dimension_semantics<arbitrary>], iteration_bounds = array<i64: 2, 1>, scalar_prefetch = 0 : i64, scratch_operands = 1 : i64, tpu.core_type = #tpu.core_type<tc>, window_params = [{transform_indices = @transform_0, window_bounds = array<i64: 8, 1>}, {pipeline_mode = #tpu.pipeline_mode<synchronous>, transform_indices = @transform_1, window_bounds = array<i64: 128, 128>}, {pipeline_mode = #tpu.pipeline_mode<synchronous>, transform_indices = @transform_2, window_bounds = array<i64: 1, 128>}, {transform_indices = @transform_3, window_bounds = array<i64: 128, 128>}, {transform_indices = @transform_4, window_bounds = array<i64: 1, 128>}, {transform_indices = @transform_5, window_bounds = array<i64: 8, 128>}]} {
    %c0_i32 = arith.constant 0 : i32
    %0 = arith.cmpi eq, %arg1, %c0_i32 : i32
    %1 = arith.extui %0 : i1 to i32
    %c0_i32_0 = arith.constant 0 : i32
    %2 = arith.cmpi ne, %1, %c0_i32_0 : i32
    scf.if %2 {
      %c0_8 = arith.constant 0 : index
      %c0_9 = arith.constant 0 : index
      %10 = vector.load %arg2[%c0_8, %c0_9] : memref<8x1xi32, #tpu.memory_space<vmem>>, vector<8x1xi32>
      %11 = tpu.iota {dimensions = array<i32: 1>} : vector<8x128xi32>
      %12 = vector.broadcast %10 : vector<8x1xi32> to vector<8x128xi32>
      %13 = arith.cmpi eq, %11, %12 : vector<8x128xi32>
      %14 = arith.extui %13 : vector<8x128xi1> to vector<8x128xi32>
      %15 = arith.sitofp %14 : vector<8x128xi32> to vector<8x128xf32>
      %16 = arith.truncf %15 : vector<8x128xf32> to vector<8x128xbf16>
      %c0_10 = arith.constant 0 : index
      %c0_11 = arith.constant 0 : index
      %17 = vector.load %arg3[%c0_10, %c0_11] : memref<128x128xbf16, #tpu.memory_space<vmem>>, vector<128x128xbf16>
      %cst_12 = arith.constant dense<0.000000e+00> : vector<8x128xf32>
      %18 = tpu.matmul %16, %17, %cst_12 {dimension_numbers = #tpu.dot_dimension_numbers<[1], [0], [0], [1], [0, 0, 1, 1], [], []>} : vector<8x128xbf16>, vector<128x128xbf16>, vector<8x128xf32> -> vector<8x128xf32>
      %c0_13 = arith.constant 0 : index
      %c0_14 = arith.constant 0 : index
      %19 = vector.load %arg4[%c0_13, %c0_14] : memref<1x128xf32, #tpu.memory_space<vmem>>, vector<1x128xf32>
      %20 = vector.broadcast %19 : vector<1x128xf32> to vector<8x128xf32>
      %21 = arith.addf %18, %20 : vector<8x128xf32>
      %22 = math.tanh %21 : vector<8x128xf32>
      %23 = arith.truncf %22 : vector<8x128xf32> to vector<8x128xbf16>
      %c0_15 = arith.constant 0 : index
      %c0_16 = arith.constant 0 : index
      %24 = vector.load %arg8[%c0_15, %c0_16] : memref<8x128xbf16, #tpu.memory_space<vmem>>, vector<8x128xbf16>
      tpu.vector_store %arg8[%c0_15, %c0_16], %23 {strides = array<i32>} : memref<8x128xbf16, #tpu.memory_space<vmem>>, vector<8x128xbf16>,
    } else {
    }
    %c0 = arith.constant 0 : index
    %c0_1 = arith.constant 0 : index
    %3 = vector.load %arg8[%c0, %c0_1] : memref<8x128xbf16, #tpu.memory_space<vmem>>, vector<8x128xbf16>
    %c0_2 = arith.constant 0 : index
    %c0_3 = arith.constant 0 : index
    %4 = vector.load %arg5[%c0_2, %c0_3] : memref<128x128xbf16, #tpu.memory_space<vmem>>, vector<128x128xbf16>
    %cst = arith.constant dense<0.000000e+00> : vector<8x128xf32>
    %5 = tpu.matmul %3, %4, %cst {dimension_numbers = #tpu.dot_dimension_numbers<[1], [0], [0], [1], [0, 0, 1, 1], [], []>} : vector<8x128xbf16>, vector<128x128xbf16>, vector<8x128xf32> -> vector<8x128xf32>
    %c0_4 = arith.constant 0 : index
    %c0_5 = arith.constant 0 : index
    %6 = vector.load %arg6[%c0_4, %c0_5] : memref<1x128xf32, #tpu.memory_space<vmem>>, vector<1x128xf32>
    %7 = vector.broadcast %6 : vector<1x128xf32> to vector<8x128xf32>
    %8 = arith.addf %5, %7 : vector<8x128xf32>
    %c0_6 = arith.constant 0 : index
    %c0_7 = arith.constant 0 : index
    %9 = vector.load %arg7[%c0_6, %c0_7] : memref<8x128xf32, #tpu.memory_space<vmem>>, vector<8x128xf32>
    tpu.vector_store %arg7[%c0_6, %c0_7], %8 {strides = array<i32>} : memref<8x128xf32, #tpu.memory_space<vmem>>, vector<8x128xf32>,
    return
  }
  func.func @transform_0(%arg0: i32, %arg1: i32) -> (i32, i32) {
    %c0_i32 = arith.constant 0 : i32
    %c0_i32_0 = arith.constant 0 : i32
    return %arg0, %c0_i32 : i32, i32
  }
  func.func @transform_1(%arg0: i32, %arg1: i32) -> (i32, i32) {
    %c0_i32 = arith.constant 0 : i32
    %c0_i32_0 = arith.constant 0 : i32
    %c0_i32_1 = arith.constant 0 : i32
    return %c0_i32, %c0_i32_0 : i32, i32
  }
  func.func @transform_2(%arg0: i32, %arg1: i32) -> (i32, i32) {
    %c0_i32 = arith.constant 0 : i32
    %c0_i32_0 = arith.constant 0 : i32
    %c0_i32_1 = arith.constant 0 : i32
    return %c0_i32, %c0_i32_0 : i32, i32
  }
  func.func @transform_3(%arg0: i32, %arg1: i32) -> (i32, i32) {
    %c0_i32 = arith.constant 0 : i32
    %c0_i32_0 = arith.constant 0 : i32
    return %c0_i32, %arg1 : i32, i32
  }
  func.func @transform_4(%arg0: i32, %arg1: i32) -> (i32, i32) {
    %c0_i32 = arith.constant 0 : i32
    %c0_i32_0 = arith.constant 0 : i32
    return %c0_i32, %arg1 : i32, i32
  }
  func.func @transform_5(%arg0: i32, %arg1: i32) -> (i32, i32) {
    %c0_i32 = arith.constant 0 : i32
    return %arg0, %arg1 : i32, i32
  }
}

</mosaic_0001>

<bundles_post_ra>
// kernel: lm_head_pallas.1
= control target key start
LH: loop header
LB: loop body
LE: loop exit
PB: predicated region body
PF: predicated region fallthrough
CT: control target
= control target key end

     0   :  { %10 = vsyncpa [#allocation4], 0  ;;  %s1090_s0 = inlined_call_operand.vmem [shape: s32[16,1], index: 0, kind: input, shape index: {}]   ;;  %s1091_s1 = inlined_call_operand.hbm [shape: bf16[128,128], index: 1, kind: input, shape index: {}]   ;;  %s1092_s2 = inlined_call_operand.vmem [shape: f32[1,128], index: 2, kind: input, shape index: {}]   ;;  %s1093_s3 = inlined_call_operand.hbm [shape: bf16[128,128], index: 3, kind: input, shape index: {}]   ;;  %s1094_s4 = inlined_call_operand.vmem [shape: f32[1,128], index: 4, kind: input, shape index: {}]   ;;  %s1095_s5 = inlined_call_operand.hbm [shape: f32[16,128], index: 5, kind: output, shape index: {}]  }
   0x1   :  { %11 = vsyncpa [#allocation7], 0 }
   0x2   :  { %12 = vsyncpa [#allocation5], 0 }
   0x3   :  { %14 = vsyncpa [#allocation5 + $0x1], 0  ;;  %s959_s18 = smov 0   ;;  %s961_s19 = smov 0  }
   0x4   :  { %s963_s20 = smov 0   ;;  %s965_s21 = smov 0  }
   0x5   :  { %s967_s22 = smov 0   ;;  %s969_s23 = smov 0  }
   0x6 LB: > { %s591_s24 = sadd.s32 4294967295, %s921_s23   ;;  %s592_s25 = sadd.s32 4294967294, %s921_s23   ;;  %s921_s23 = sphi %s969_s23, %s20_s23   ;;  %s917_s22 = sphi %s967_s22, %s1104_s22   ;;  %s913_s21 = sphi %s965_s21, %s1103_s21   ;;  %s909_s20 = sphi %s963_s20, %s1102_s20   ;;  %s905_s19 = sphi %s961_s19, %s1101_s19   ;;  %s901_s18 = sphi %s959_s18, %s1100_s18  }
   0x7   : > { %s32_s26 = sadd.s32 1, %s917_s22  ;;  %s161_s27 = sadd.s32 1, %s909_s20 }
   0x8   : > { %p34_p0 = scmp.ge.s32.totalorder %s32_s26, 2  ;;  %p171_p1 = scmp.ne.s32.totalorder %s909_s20, %s905_s19 }
   0x9   : > { %p172_p2 = scmp.eq.s32.totalorder %s591_s24, 1  ;;  %p177_p3 = scmp.ne.s32.totalorder %s905_s19, %s901_s18 }
   0xa   : > { %s1106_s26 = smov (%p34_p0, %s32_s26), 0  ;;  %p178_p5 = scmp.eq.s32.totalorder %s592_s25, 1 }
   0xb   : > { %p999_p4 = por %p172_p2, %p171_p1  ;;  %s156_s29 = ssub.s32 %s917_s22, %s1106_s26 }
   0xc   : > { %p593_p6 = scmp.ge.s32.totalorder %s921_s23, 1  ;;  %p159_p7 = scmp.eq.s32.totalorder %s156_s29, 0 }
   0xd   : > { %p1006_p8 = por %p178_p5, %p177_p3  ;;  %p185_p9 = scmp.lt.s32.totalorder %s921_s23, 3 }
   0xe   : > { %s1012_s6 = scalar_select %p159_p7, %s909_s20, %s161_s27  }
   0xf   : > { %p1014_p10 = pnand %p593_p6, %p185_p9  ;;  %p1018_p11 = scmp.eq.s32.totalorder %s591_s24, 0 }
  0x10   : > { %s196_s11 = sshll.u32 %s1091_s1, 4  ;;  %s923_s12 = smov [#allocation3]   ;;  %s197_s11 = int_to_ptr.hbm [resolvable:$true] %s196_s11 }
  0x11   : > { %p700_p12 = pneg %p1014_p10  ;;  %s198_s13 = sshll.u32 %s923_s12, 4  ;;  %s199_s13 = int_to_ptr.vmem [resolvable:$true] %s198_s13 }
  0x12   : > { %s215_s16 = sshll.u32 %s1093_s3, 4  ;;  %s924_s17 = smov 64   ;;  %s216_s16 = int_to_ptr.hbm [resolvable:$true] %s215_s16 }
  0x13   : > { %p701_p13 = pnand %p1018_p11, %p700_p12  ;;  %s925_s24 = smov 4  }
  0x14   : > { %s926_s25 = smov [#allocation6]   ;;  %246 = sbr.rel (%p1014_p10) target bundleno = 431 (0x1af), region = 40 }
  0x15   : > { %703 = dma.hbm_to_vmem [thread:$0]  (!%p701_p13), %s197_s11, 1024, %s199_s13, [#allocation4], %s924_s17, %s924_s17, %s925_s24  }
  0x16   : > { %s217_s27 = sshll.u32 %s926_s25, 4  ;;  %s218_s27 = int_to_ptr.vmem [resolvable:$true] %s217_s27 }
  0x17   : > { %706 = dma.hbm_to_vmem [thread:$0]  (!%p701_p13), %s216_s16, 1024, %s218_s27, [#allocation7], %s924_s17, %s924_s17, %s925_s24  }
  0x19   : > { %888 = dma.done.wait (%p1018_p11), [#allocation4], 1024  }
  0x1a   : > { %890 = vsyncadd (%p1018_p11), [#allocation4], 4294966272 }
  0x1b   : > { %892 = dma.done.wait (%p1018_p11), [#allocation7], 1024  }
  0x1c   : > { %894 = vsyncadd (%p1018_p11), [#allocation7], 4294966272  ;;  %p282_p0 = scmp.lt.s32.totalorder %s913_s21, 1  ;;  %v927_v0 = vmov 0   ;;  %v681_v2 = vld [vmem:[#allocation3 + $0x38] sm:$0xff]  ;;  %v680_v3 = vld [vmem:[#allocation3 + $0x30] sm:$0xff]  ;;  %v294_v13 = vlaneseq }
  0x1d   : > { %770 = vset.pattern.permute.xlu0 %v927_v0  ;;  %371 = vmatpush.bf16.msra.mxu0 %v681_v2  ;;  %v679_v4 = vld [vmem:[#allocation3 + $0x28] sm:$0xff]  ;;  %v678_v5 = vld [vmem:[#allocation3 + $0x20] sm:$0xff]  ;;  %v677_v6 = vld [vmem:[#allocation3 + $0x18] sm:$0xff]  ;;  %v928_v16 = vmov 1.0|1.0   ;;  %s279_s13 = sand.u32 1, %s905_s19  }
  0x1e   : > { %s283_s29 = scalar_select %p282_p0, %s913_s21, 1  ;;  %v676_v7 = vld [vmem:[#allocation3 + $0x10] sm:$0xff]  ;;  %v675_v8 = vld [vmem:[#allocation3 + $0x8] sm:$0xff]  ;;  %v674_v9 = vld [vmem:[#allocation3] sm:$0xff]  ;;  %v295_v14 = vand.u32 127, %v294_v13 }
  0x1f   : > { %v689_v10 = vld [vmem:[#allocation6 + $0x38] sm:$0xff]  ;;  %v688_v11 = vld [vmem:[#allocation6 + $0x30] sm:$0xff]  ;;  %v687_v12 = vld [vmem:[#allocation6 + $0x28] sm:$0xff]  ;;  %s671_s14 = sshll.u32 %s913_s21, 3  ;;  %s601_s15 = sshll.u32 %s279_s13, 3 }
  0x20   : > { %s602_s7 = sshll.u32 %s283_s29, 3  ;;  %456 = vmatpush.bf16.msra.mxu1 %v689_v10  ;;  %v686_v17 = vld [vmem:[#allocation6 + $0x20] sm:$0xff]  ;;  %v685_v18 = vld [vmem:[#allocation6 + $0x18] sm:$0xff]  ;;  %v684_v19 = vld [vmem:[#allocation6 + $0x10] sm:$0xff]  ;;  %s482_s24 = scalar_lea.hbm %s1095_s5, %s671_s14 }
  0x21   : > { %s285_s11 = scalar_lea.vmem %s1090_s0, %s602_s7  ;;  %372 = vmatpush.bf16.msra.mxu0 %v680_v3  ;;  %v683_v20 = vld [vmem:[#allocation6 + $0x8] sm:$0xff]  ;;  %v682_v21 = vld [vmem:[#allocation6] sm:$0xff]  ;;  %v771_v22 = vld [vmem:[%s1092_s2] ss:$0 sm:$0xff]  ;;  %s281_s29 = scalar_lea.vmem [#allocation8], %s601_s15 }
  0x22   : > { %v293_v1 = vld [vmem:[%s285_s11] sm:$0xff]  ;;  %s484_s7 = sshll.u32 %s281_s29, 4  ;;  %s486_s9 = sshll.u32 %s482_s24, 4  ;;  %s485_s7 = int_to_ptr.vmem [resolvable:$true] %s484_s7  ;;  %s487_s9 = int_to_ptr.hbm [resolvable:$true] %s486_s9 }
  0x23   : > { %297 = vperm.xlu0 %770, %v293_v1   ;;  %v772_v29 = vld [vmem:[%s1094_s4] ss:$0 sm:$0xff]  ;;  %s471_s10 = scalar_lea.sflag [#allocation5], %s279_s13  ;;  %s849_s21 = sshra.s32 %s487_s9, 4  ;;  %s850_s21 = int_to_ptr.hbm [resolvable:$true] %s849_s21 }
  0x24   : > { %457 = vmatpush.bf16.msra.mxu1 %v688_v11  ;;  %s851_s11 = scalar_lea.hbm %s850_s21, 8  ;;  %s855_s14 = scalar_lea.hbm %s1095_s5, 16 }
  0x25   : > { %373 = vmatpush.bf16.msra.mxu0 %v679_v4  ;;  %p852_p1 = scmp.ne.s32.totalorder %s850_s21, %s851_s11  ;;  %p856_p5 = scmp.lt.s32.totalorder %s850_s21, %s1095_s5 }
  0x26   : > { %p857_p6 = scmp.lt.s32.totalorder %s855_s14, %s851_s11 }
  0x27   : > { %p853_p2 = pnand %p852_p1, %p999_p4 }
  0x28   : > { %458 = vmatpush.bf16.msra.mxu1 %v687_v12  ;;  %p858_p7 = por %p857_p6, %p856_p5 }
  0x29   : > { %374 = vmatpush.bf16.msra.mxu0 %v678_v5  ;;  %p854_p3 = pneg %p853_p2 }
  0x2b   : > { %p859_p9 = pnand %p858_p7, %p854_p3 }
  0x2c   : > { %459 = vmatpush.bf16.msra.mxu1 %v686_v17 }
  0x2d   : > { %375 = vmatpush.bf16.msra.mxu0 %v677_v6 }
  0x30   : > { %460 = vmatpush.bf16.msra.mxu1 %v685_v18 }
  0x31   : > { %376 = vmatpush.bf16.msra.mxu0 %v676_v7 }
  0x34   : > { %461 = vmatpush.bf16.msra.mxu1 %v684_v19 }
  0x35   : > { %377 = vmatpush.bf16.msra.mxu0 %v675_v8 }
  0x38   : > { %462 = vmatpush.bf16.msra.mxu1 %v683_v20 }
  0x39   : > { %378 = vmatpush.bf16.msra.mxu0 %v674_v9 }
  0x3c   : > { %463 = vmatpush.bf16.msra.mxu1 %v682_v21 }
  0x95   : > { %v298_v15 = vpop.permute.xlu0 %297 }
  0x96   : > { %vm299_vm0 = vcmp.eq.s32.totalorder %v295_v14, %v298_v15 }
  0x97   : > { %vm636_vm1 = vmpackc.low %vm299_vm0, %vm299_vm0 }
  0x98   : > { %637 = vmatmul.msk.bf16.vlgmr.msra.gmra.mxu0 %vm636_vm1, %v928_v16 }
 0x115   : > { %v380_v23 = vpop.f32.mrf.mxu0 }
 0x116   : > { %v381_v24 = vadd.f32 %v771_v22, %v380_v23 }
 0x118   : > { %773 = vtanh.f32 %v381_v24 }
 0x11d   : > { %v382_v25 = vpop.f32.mrf.mxu0 }
 0x11e   : > { %v774_v26 = vpop.eup %773 }
 0x11f   : > { %v385_v27 = vpack.c.bf16 %v774_v26, %v774_v26 }
 0x121   : > { %386 = vst [vmem:[#allocation2] sm:$0xf] %v385_v27 }
 0x128   : > { %v387_v28 = vld [vmem:[#allocation2] sm:$0xf] }
 0x129   : > { %464 = vmatmul.bf16.vlgmr.msra.gmra.mxu1 %v387_v28 }
 0x1a6   : > { %v465_v30 = vpop.f32.mrf.mxu1 }
 0x1a7   : > { %v466_v31 = vadd.f32 %v772_v29, %v465_v30 }
 0x1a9   : > { %469 = vst [vmem:[%s281_s29] sm:$0xff] %v466_v31 }
 0x1aa   : > { %862 = shalt.err (!%p859_p9)
}
 0x1ab   : > { %698 = dma.vmem_to_hbm [thread:$0]  (%p999_p4), %s485_s7, 128, %s487_s9, %s471_s10  }
 0x1ae   : > { %v467_v32 = vpop.f32.mrf.mxu1 }
 0x1af PF: > { %p715_p10 = scmp.ge.s32.totalorder %s921_s23, 2  ;;  %s498_s13 = sand.u32 1, %s901_s18  }
 0x1b0   : > { %s499_s17 = scalar_lea.sflag [#allocation5], %s498_s13 }
 0x1b1   : > { %p708_p11 = pnand %p715_p10, %p1006_p8 }
 0x1b3   : > { %p709_p12 = pneg %p708_p11 }
 0x1b5   : > { %896 = dma.done.wait (%p709_p12), %s499_s17, 128  }
 0x1b6   : > { %898 = vsyncadd (%p709_p12), %s499_s17, 4294967168  ;;  %s20_s23 = sadd.s32 1, %s921_s23   ;;  %s1100_s18 = smov %s905_s19 }
 0x1b7   : > { %p17_p13 = scmp.ge.s32.totalorder %s20_s23, 4   ;;  %s1101_s19 = smov %s909_s20 }
 0x1b8   : > { %s1102_s20 = smov %s1012_s6  ;;  %s1103_s21 = smov %s917_s22 }
 0x1b9   : > { %s1104_s22 = smov %s1106_s26  ;;  %19 = sbr.rel (!%p17_p13) target bundleno = 6 (0x6), region = 92 }
 0x1be   :  { %505 = vsyncpa [#allocation4], 1 }
 0x1bf   :  { %507 = vsyncpa [#allocation4 + $0x1], 1 }
 0x1c0   :  { %508 = vsyncpa [#allocation7], 1 }
 0x1c1   :  { %509 = vsyncpa [#allocation5], 1 }
 0x1c2   :  { %511 = vsyncpa [#allocation5 + $0x1], 1 }

</bundles_post_ra>
